<compile_context>
chip_gen: v7x
topology: tpu7x:2x2x1
jax: 0.10.0
libtpu: 0.0.40
codegen_flags: <defaults>
</compile_context>

<pallas_src>
import functools

import jax
import jax.numpy as jnp
from jax.experimental import pallas as pl
from jax.experimental.pallas import tpu as pltpu


def _round_up(v, m):
    return ((v + m - 1) // m) * m


def _pick_tile_n(n, tn_max):
    """Largest N-tile (multiple of 128, <= tn_max) dividing the padded N that
    still leaves >= 2 j-blocks, so the 'parallel' j axis shards across both
    v7x TensorCores.  Falls back to a single block only when N <= 128."""
    n_pad = _round_up(n, 128)
    q = n_pad // 128
    for d in range(min(q, max(tn_max // 128, 1)), 0, -1):
        if q % d == 0 and (q // d) >= 2:
            return 128 * d, n_pad
    return n_pad, n_pad


def _pick_tile_k(k, tk_max=2048):
    """K tile: multiple of 128, clamped to tk_max; padded K stays minimal
    (round_up(K, 128) when K < tk_max, otherwise a multiple of tk_max)."""
    tk = min(tk_max, _round_up(k, 128))
    kp = _round_up(k, tk)
    return tk, kp


def _fused_linear_kernel(x_ref, w_ref, b_ref, o_ref, *, apply_relu):
    """o[i, j] accumulates x[i, :] . w[j, :]^T over the K grid axis; bias
    (+ReLU) applied on the last K step.

    Grid = (M-blocks, N-blocks, K-blocks); K is innermost ("arbitrary") and the
    output block index is constant over it, so o_ref stays VMEM-resident and is
    used directly as the f32 accumulator (no scratch)."""
    k = pl.program_id(2)

    @pl.when(k == 0)
    def _():
        o_ref[...] = jnp.zeros_like(o_ref)

    x = x_ref[...]
    w = w_ref[...]                      # native storage dtype straight to the MXU
    if x.dtype != w.dtype:
        x = x.astype(w.dtype)           # bf16 weights: cast the tiny x tile, not w
    # Contract x's K (dim 1) with w's K (dim 1): PyTorch (out, in) layout,
    # no HBM-level transpose; f32 accumulation on the MXU.
    o_ref[...] += jax.lax.dot_general(
        x, w,
        dimension_numbers=(((1,), (1,)), ((), ())),
        preferred_element_type=jnp.float32,
    )

    @pl.when(k == pl.num_programs(2) - 1)
    def _():
        y = o_ref[...] + b_ref[...].astype(jnp.float32)
        if apply_relu:
            y = jnp.maximum(y, 0.0)
        o_ref[...] = y


def pallas_linear(x, w_pad, b_pad, *, n_out, tn, tk, apply_relu):
    """y = x @ w.T + b (optionally ReLU), w in PyTorch (out, in) layout.

    w_pad: [Np, Kp] ALREADY zero-padded at parameter-load time (Np % tn == 0,
    Kp % tk == 0).  b_pad: [1, Np].  Only the tiny activation (a few rows) is
    padded per call.  Returns [M, n_out] float32.
    """
    M, K = x.shape
    Np, Kp = w_pad.shape
    assert Np % tn == 0 and Kp % tk == 0 and K <= Kp and b_pad.shape == (1, Np)

    tm = min(256, _round_up(M, 8))
    Mp = _round_up(M, tm)
    if (Mp, Kp) != (M, K):
        x = jnp.pad(x, ((0, Mp - M), (0, Kp - K)))   # ~8 rows: negligible

    grid = (Mp // tm, Np // tn, Kp // tk)

    w_bytes = jnp.dtype(w_pad.dtype).itemsize
    x_bytes = jnp.dtype(x.dtype).itemsize
    vmem_needed = (
        2 * tm * tk * x_bytes        # x tiles (double-buffered)
        + 2 * tn * tk * w_bytes      # weight tiles (dominant HBM stream)
        + 2 * tm * tn * 4            # output / f32 accumulator tiles
        + 2 * 8 * tn * w_bytes       # bias tile (sublane-padded)
        + tm * tk * w_bytes          # in-kernel x->bf16 cast temp (worst case)
    )
    vmem_limit = int(min(max(vmem_needed + (8 << 20), 32 << 20), 100 << 20))

    kernel = functools.partial(_fused_linear_kernel, apply_relu=apply_relu)

    out = pl.pallas_call(
        kernel,
        out_shape=jax.ShapeDtypeStruct((Mp, Np), jnp.float32),
        grid_spec=pltpu.PrefetchScalarGridSpec(
            num_scalar_prefetch=0,
            grid=grid,
            in_specs=[
                pl.BlockSpec((tm, tk), lambda i, j, k: (i, k)),   # x  [M, K]
                pl.BlockSpec((tn, tk), lambda i, j, k: (j, k)),   # w  [N, K] (out, in)
                pl.BlockSpec((1, tn), lambda i, j, k: (0, j)),    # b  [1, N]
            ],
            out_specs=pl.BlockSpec((tm, tn), lambda i, j, k: (i, j)),
        ),
        compiler_params=pltpu.CompilerParams(
            dimension_semantics=("parallel", "parallel", "arbitrary"),
            vmem_limit_bytes=vmem_limit,
        ),
    )(x, w_pad, b_pad)

    if (Mp, Np) != (M, n_out):
        out = out[:M, :n_out]
    return out


def make_deep_synergy_forward(params, *, weight_dtype=None, tk_max=2048, tn_max=None):
    """Pad/cast weights ONCE (hoisted out of the jitted per-call path), choose
    per-layer tiles, and return a jitted forward matching DeepSynergy.forward
    in eval mode (dropout = identity).

    params: ((w1, b1), (w2, b2), (w3, b3)), PyTorch Linear layout (out, in).
    weight_dtype: e.g. jnp.bfloat16 to halve weight HBM bytes (f32 accumulate).
    """
    hidden_layers, out_layer = params[:-1], params[-1]

    metas = []      # static per-layer config, closed over by the jitted fn
    buffers = []    # padded device arrays, passed as jit arguments
    for w, b in hidden_layers:
        if weight_dtype is not None:
            w = w.astype(weight_dtype)
            b = b.astype(weight_dtype)
        n, k = w.shape
        cap = tn_max if tn_max is not None else (
            4096 if w.dtype == jnp.bfloat16 else 2048)
        tn, n_pad = _pick_tile_n(n, cap)
        tk, k_pad = _pick_tile_k(k, tk_max)
        w_pad = jnp.pad(w, ((0, n_pad - n), (0, k_pad - k))) if (n_pad, k_pad) != (n, k) else w
        b_pad = (jnp.pad(b, (0, n_pad - n)) if n_pad != n else b).reshape(1, n_pad)
        metas.append((n, tn, tk))
        buffers.append((w_pad, b_pad))

    # Final nn.Linear(4096, 2): lane-sparse (2 output columns, tiny) -> plain JAX.
    w3, b3 = out_layer
    buffers.append((jnp.asarray(w3, jnp.float32).T, jnp.asarray(b3, jnp.float32)))
    buffers = tuple(buffers)

    def forward(x, bufs):
        h = x
        for (n_out, tn, tk), (w_pad, b_pad) in zip(metas, bufs[:-1]):
            # fc + ReLU fused in-kernel; dropout layers are eval-mode identities.
            h = pallas_linear(h, w_pad, b_pad, n_out=n_out, tn=tn, tk=tk,
                              apply_relu=True)
        w3t, b3f = bufs[-1]
        return jnp.dot(h, w3t, preferred_element_type=jnp.float32) + b3f

    jitted = jax.jit(forward)
    return lambda x: jitted(x, buffers)


def init_params(key, in_features, hidden1, hidden2, n_output, dtype=jnp.float32):
    """Deterministic synthetic parameters (PyTorch Linear shapes: W (out, in), b (out,))."""
    ks = jax.random.split(key, 6)

    def lin(kw, kb, fan_in, fan_out):
        bound = 1.0 / jnp.sqrt(fan_in)
        w = jax.random.uniform(kw, (fan_out, fan_in), dtype, -bound, bound)
        b = jax.random.uniform(kb, (fan_out,), dtype, -bound, bound)
        return w, b

    return (
        lin(ks[0], ks[1], in_features, hidden1),
        lin(ks[2], ks[3], hidden1, hidden2),
        lin(ks[4], ks[5], hidden2, n_output),
    )


if __name__ == "__main__":
    # Small shapes consistent with the module's structure; the real module uses
    # in = (256+346+200)*2 + 37261 = 38865, fc1 -> 8182, fc2 -> 4096, out -> 2.
    batch, in_features, hidden1, hidden2, n_output = 8, 512, 256, 128, 2

    key = jax.random.PRNGKey(0)
    k_x, k_p = jax.random.split(key)
    x = jax.random.normal(k_x, (batch, in_features), dtype=jnp.float32)
    params = init_params(k_p, in_features, hidden1, hidden2, n_output)
    (w1, b1), (w2, b2), (w3, b3) = params

    HI = jax.lax.Precision.HIGHEST

    def ref_forward(xx, ww1, bb1, ww2, bb2, ww3, bb3):
        h = jnp.maximum(jnp.dot(xx, ww1.T, precision=HI) + bb1, 0.0)
        h = jnp.maximum(jnp.dot(h, ww2.T, precision=HI) + bb2, 0.0)
        return jnp.dot(h, ww3.T, precision=HI) + bb3

    # ---- f32 weights ----
    fwd_f32 = make_deep_synergy_forward(params)
    y = fwd_f32(x)
    jax.block_until_ready(y)
    ref = ref_forward(x, w1, b1, w2, b2, w3, b3)
    assert y.shape == (batch, n_output)
    assert jnp.allclose(y, ref, atol=2e-3, rtol=2e-3)

    # ---- bf16-stored weights (native bf16 MXU feed, f32 accumulate) ----
    fwd_bf16 = make_deep_synergy_forward(params, weight_dtype=jnp.bfloat16)
    y_bf16 = fwd_bf16(x)
    jax.block_until_ready(y_bf16)
    w1b = w1.astype(jnp.bfloat16).astype(jnp.float32)
    b1b = b1.astype(jnp.bfloat16).astype(jnp.float32)
    w2b = w2.astype(jnp.bfloat16).astype(jnp.float32)
    b2b = b2.astype(jnp.bfloat16).astype(jnp.float32)
    ref_b = ref_forward(x, w1b, b1b, w2b, b2b, w3, b3)
    assert jnp.allclose(y_bf16, ref_b, atol=3e-2, rtol=3e-2)

    print("KERNEL_OK")
</pallas_src>

<mosaic_0001>
module attributes {stable_mosaic.version = 11 : i64} {
  func.func @_fused_linear_kernel(%arg0: i32, %arg1: i32, %arg2: i32, %arg3: memref<8x512xf32, #tpu.memory_space<vmem>>, %arg4: memref<128x512xf32, #tpu.memory_space<vmem>>, %arg5: memref<1x128xf32, #tpu.memory_space<vmem>>, %arg6: memref<8x128xf32, #tpu.memory_space<vmem>>) attributes {dimension_semantics = [#tpu.dimension_semantics<parallel>, #tpu.dimension_semantics<parallel>, #tpu.dimension_semantics<arbitrary>], iteration_bounds = array<i64: 1, 2, 1>, scalar_prefetch = 0 : i64, scratch_operands = 0 : i64, tpu.core_type = #tpu.core_type<tc>, window_params = [{transform_indices = @transform_0, window_bounds = array<i64: 8, 512>}, {transform_indices = @transform_1, window_bounds = array<i64: 128, 512>}, {transform_indices = @transform_2, window_bounds = array<i64: 1, 128>}, {transform_indices = @transform_3, window_bounds = array<i64: 8, 128>}]} {
    %c0_i32 = arith.constant 0 : i32
    %0 = arith.cmpi eq, %arg2, %c0_i32 : i32
    %1 = arith.extui %0 : i1 to i32
    %c0_i32_0 = arith.constant 0 : i32
    %2 = arith.cmpi ne, %1, %c0_i32_0 : i32
    scf.if %2 {
      %cst_10 = arith.constant 0.000000e+00 : f32
      %12 = vector.broadcast %cst_10 : f32 to vector<8x128xf32>
      %c0_11 = arith.constant 0 : index
      %c0_12 = arith.constant 0 : index
      %13 = vector.load %arg6[%c0_11, %c0_12] : memref<8x128xf32, #tpu.memory_space<vmem>>, vector<8x128xf32>
      tpu.vector_store %arg6[%c0_11, %c0_12], %12 {strides = array<i32>} : memref<8x128xf32, #tpu.memory_space<vmem>>, vector<8x128xf32>,
    } else {
    }
    %c0 = arith.constant 0 : index
    %c0_1 = arith.constant 0 : index
    %3 = vector.load %arg3[%c0, %c0_1] : memref<8x512xf32, #tpu.memory_space<vmem>>, vector<8x512xf32>
    %c0_2 = arith.constant 0 : index
    %c0_3 = arith.constant 0 : index
    %4 = vector.load %arg4[%c0_2, %c0_3] : memref<128x512xf32, #tpu.memory_space<vmem>>, vector<128x512xf32>
    %c0_4 = arith.constant 0 : index
    %c0_5 = arith.constant 0 : index
    %5 = vector.load %arg6[%c0_4, %c0_5] : memref<8x128xf32, #tpu.memory_space<vmem>>, vector<8x128xf32>
    %cst = arith.constant dense<0.000000e+00> : vector<8x128xf32>
    %6 = tpu.matmul %3, %4, %cst {dimension_numbers = #tpu.dot_dimension_numbers<[1], [1], [0], [0], [0, 0, 1, 0], [], []>} : vector<8x512xf32>, vector<128x512xf32>, vector<8x128xf32> -> vector<8x128xf32>
    %7 = arith.addf %5, %6 : vector<8x128xf32>
    %c0_6 = arith.constant 0 : index
    %c0_7 = arith.constant 0 : index
    %8 = vector.load %arg6[%c0_6, %c0_7] : memref<8x128xf32, #tpu.memory_space<vmem>>, vector<8x128xf32>
    tpu.vector_store %arg6[%c0_6, %c0_7], %7 {strides = array<i32>} : memref<8x128xf32, #tpu.memory_space<vmem>>, vector<8x128xf32>,
    %c0_i32_8 = arith.constant 0 : i32
    %9 = arith.cmpi eq, %arg2, %c0_i32_8 : i32
    %10 = arith.extui %9 : i1 to i32
    %c0_i32_9 = arith.constant 0 : i32
    %11 = arith.cmpi ne, %10, %c0_i32_9 : i32
    scf.if %11 {
      %c0_10 = arith.constant 0 : index
      %c0_11 = arith.constant 0 : index
      %12 = vector.load %arg6[%c0_10, %c0_11] : memref<8x128xf32, #tpu.memory_space<vmem>>, vector<8x128xf32>
      %c0_12 = arith.constant 0 : index
      %c0_13 = arith.constant 0 : index
      %13 = vector.load %arg5[%c0_12, %c0_13] : memref<1x128xf32, #tpu.memory_space<vmem>>, vector<1x128xf32>
      %14 = vector.broadcast %13 : vector<1x128xf32> to vector<8x128xf32>
      %15 = arith.addf %12, %14 : vector<8x128xf32>
      %cst_14 = arith.constant 0.000000e+00 : f32
      %16 = vector.broadcast %cst_14 : f32 to vector<8x128xf32>
      %17 = arith.maximumf %15, %16 : vector<8x128xf32>
      %c0_15 = arith.constant 0 : index
      %c0_16 = arith.constant 0 : index
      %18 = vector.load %arg6[%c0_15, %c0_16] : memref<8x128xf32, #tpu.memory_space<vmem>>, vector<8x128xf32>
      tpu.vector_store %arg6[%c0_15, %c0_16], %17 {strides = array<i32>} : memref<8x128xf32, #tpu.memory_space<vmem>>, vector<8x128xf32>,
    } else {
    }
    return
  }
  func.func @transform_0(%arg0: i32, %arg1: i32, %arg2: i32) -> (i32, i32) {
    %c0_i32 = arith.constant 0 : i32
    return %arg0, %arg2 : i32, i32
  }
  func.func @transform_1(%arg0: i32, %arg1: i32, %arg2: i32) -> (i32, i32) {
    %c0_i32 = arith.constant 0 : i32
    return %arg1, %arg2 : i32, i32
  }
  func.func @transform_2(%arg0: i32, %arg1: i32, %arg2: i32) -> (i32, i32) {
    %c0_i32 = arith.constant 0 : i32
    %c0_i32_0 = arith.constant 0 : i32
    return %c0_i32, %arg1 : i32, i32
  }
  func.func @transform_3(%arg0: i32, %arg1: i32, %arg2: i32) -> (i32, i32) {
    %c0_i32 = arith.constant 0 : i32
    return %arg0, %arg1 : i32, i32
  }
}

module attributes {stable_mosaic.version = 11 : i64} {
  func.func @_fused_linear_kernel(%arg0: i32, %arg1: i32, %arg2: i32, %arg3: memref<8x256xf32, #tpu.memory_space<vmem>>, %arg4: memref<128x256xf32, #tpu.memory_space<vmem>>, %arg5: memref<1x128xf32, #tpu.memory_space<vmem>>, %arg6: memref<8x128xf32, #tpu.memory_space<vmem>>) attributes {dimension_semantics = [#tpu.dimension_semantics<parallel>, #tpu.dimension_semantics<parallel>, #tpu.dimension_semantics<arbitrary>], iteration_bounds = array<i64: 1, 1, 1>, scalar_prefetch = 0 : i64, scratch_operands = 0 : i64, tpu.core_type = #tpu.core_type<tc>, window_params = [{transform_indices = @transform_0, window_bounds = array<i64: 8, 256>}, {transform_indices = @transform_1, window_bounds = array<i64: 128, 256>}, {transform_indices = @transform_2, window_bounds = array<i64: 1, 128>}, {transform_indices = @transform_3, window_bounds = array<i64: 8, 128>}]} {
    %c0_i32 = arith.constant 0 : i32
    %0 = arith.cmpi eq, %arg2, %c0_i32 : i32
    %1 = arith.extui %0 : i1 to i32
    %c0_i32_0 = arith.constant 0 : i32
    %2 = arith.cmpi ne, %1, %c0_i32_0 : i32
    scf.if %2 {
      %cst_10 = arith.constant 0.000000e+00 : f32
      %12 = vector.broadcast %cst_10 : f32 to vector<8x128xf32>
      %c0_11 = arith.constant 0 : index
      %c0_12 = arith.constant 0 : index
      %13 = vector.load %arg6[%c0_11, %c0_12] : memref<8x128xf32, #tpu.memory_space<vmem>>, vector<8x128xf32>
      tpu.vector_store %arg6[%c0_11, %c0_12], %12 {strides = array<i32>} : memref<8x128xf32, #tpu.memory_space<vmem>>, vector<8x128xf32>,
    } else {
    }
    %c0 = arith.constant 0 : index
    %c0_1 = arith.constant 0 : index
    %3 = vector.load %arg3[%c0, %c0_1] : memref<8x256xf32, #tpu.memory_space<vmem>>, vector<8x256xf32>
    %c0_2 = arith.constant 0 : index
    %c0_3 = arith.constant 0 : index
    %4 = vector.load %arg4[%c0_2, %c0_3] : memref<128x256xf32, #tpu.memory_space<vmem>>, vector<128x256xf32>
    %c0_4 = arith.constant 0 : index
    %c0_5 = arith.constant 0 : index
    %5 = vector.load %arg6[%c0_4, %c0_5] : memref<8x128xf32, #tpu.memory_space<vmem>>, vector<8x128xf32>
    %cst = arith.constant dense<0.000000e+00> : vector<8x128xf32>
    %6 = tpu.matmul %3, %4, %cst {dimension_numbers = #tpu.dot_dimension_numbers<[1], [1], [0], [0], [0, 0, 1, 0], [], []>} : vector<8x256xf32>, vector<128x256xf32>, vector<8x128xf32> -> vector<8x128xf32>
    %7 = arith.addf %5, %6 : vector<8x128xf32>
    %c0_6 = arith.constant 0 : index
    %c0_7 = arith.constant 0 : index
    %8 = vector.load %arg6[%c0_6, %c0_7] : memref<8x128xf32, #tpu.memory_space<vmem>>, vector<8x128xf32>
    tpu.vector_store %arg6[%c0_6, %c0_7], %7 {strides = array<i32>} : memref<8x128xf32, #tpu.memory_space<vmem>>, vector<8x128xf32>,
    %c0_i32_8 = arith.constant 0 : i32
    %9 = arith.cmpi eq, %arg2, %c0_i32_8 : i32
    %10 = arith.extui %9 : i1 to i32
    %c0_i32_9 = arith.constant 0 : i32
    %11 = arith.cmpi ne, %10, %c0_i32_9 : i32
    scf.if %11 {
      %c0_10 = arith.constant 0 : index
      %c0_11 = arith.constant 0 : index
      %12 = vector.load %arg6[%c0_10, %c0_11] : memref<8x128xf32, #tpu.memory_space<vmem>>, vector<8x128xf32>
      %c0_12 = arith.constant 0 : index
      %c0_13 = arith.constant 0 : index
      %13 = vector.load %arg5[%c0_12, %c0_13] : memref<1x128xf32, #tpu.memory_space<vmem>>, vector<1x128xf32>
      %14 = vector.broadcast %13 : vector<1x128xf32> to vector<8x128xf32>
      %15 = arith.addf %12, %14 : vector<8x128xf32>
      %cst_14 = arith.constant 0.000000e+00 : f32
      %16 = vector.broadcast %cst_14 : f32 to vector<8x128xf32>
      %17 = arith.maximumf %15, %16 : vector<8x128xf32>
      %c0_15 = arith.constant 0 : index
      %c0_16 = arith.constant 0 : index
      %18 = vector.load %arg6[%c0_15, %c0_16] : memref<8x128xf32, #tpu.memory_space<vmem>>, vector<8x128xf32>
      tpu.vector_store %arg6[%c0_15, %c0_16], %17 {strides = array<i32>} : memref<8x128xf32, #tpu.memory_space<vmem>>, vector<8x128xf32>,
    } else {
    }
    return
  }
  func.func @transform_0(%arg0: i32, %arg1: i32, %arg2: i32) -> (i32, i32) {
    %c0_i32 = arith.constant 0 : i32
    return %arg0, %arg2 : i32, i32
  }
  func.func @transform_1(%arg0: i32, %arg1: i32, %arg2: i32) -> (i32, i32) {
    %c0_i32 = arith.constant 0 : i32
    return %arg1, %arg2 : i32, i32
  }
  func.func @transform_2(%arg0: i32, %arg1: i32, %arg2: i32) -> (i32, i32) {
    %c0_i32 = arith.constant 0 : i32
    %c0_i32_0 = arith.constant 0 : i32
    return %c0_i32, %arg1 : i32, i32
  }
  func.func @transform_3(%arg0: i32, %arg1: i32, %arg2: i32) -> (i32, i32) {
    %c0_i32 = arith.constant 0 : i32
    return %arg0, %arg1 : i32, i32
  }
}

</mosaic_0001>

<bundles_post_ra>
// kernel: forward.3
= control target key start
LH: loop header
LB: loop body
LE: loop exit
PB: predicated region body
PF: predicated region fallthrough
CT: control target
= control target key end

     0   :  { %s306_s1 = inlined_call_operand.vmem [shape: f32[128,256], index: 1, kind: input, shape index: {}]   ;;  %s307_s0 = inlined_call_operand.vmem [shape: f32[8,256], index: 0, kind: input, shape index: {}]   ;;  %s308_s2 = inlined_call_operand.vmem [shape: f32[1,128], index: 2, kind: input, shape index: {}]   ;;  %s309_s3 = inlined_call_operand.vmem [shape: f32[8,128], index: 3, kind: output, shape index: {}]  }
   0x1   :  { %v22_v0 = vld [vmem:[%s306_s1 + $0x8] sm:$0xff]  ;;  %v24_v1 = vld [vmem:[%s306_s1 + $0x18] sm:$0xff]  ;;  %v21_v2 = vld [vmem:[%s306_s1] sm:$0xff] }
   0x2   :  { %v145_v3 = vpack.c.bf16 %v24_v1, %v22_v0  ;;  %v23_v4 = vld [vmem:[%s306_s1 + $0x10] sm:$0xff]  ;;  %v26_v5 = vld [vmem:[%s306_s1 + $0x28] sm:$0xff]  ;;  %v28_v6 = vld [vmem:[%s306_s1 + $0x38] sm:$0xff] }
   0x3   :  { %v147_v7 = vpack.c.bf16 %v23_v4, %v21_v2  ;;  %v149_v8 = vpack.c.bf16 %v28_v6, %v26_v5  ;;  %v25_v9 = vld [vmem:[%s306_s1 + $0x20] sm:$0xff]  ;;  %v27_v10 = vld [vmem:[%s306_s1 + $0x30] sm:$0xff]  ;;  %v30_v11 = vld [vmem:[%s306_s1 + $0x48] sm:$0xff] }
   0x4   :  { %146 = vmatprep.subr.bf16.mxu0 %v145_v3  ;;  %v32_v12 = vld [vmem:[%s306_s1 + $0x58] sm:$0xff]  ;;  %v151_v13 = vpack.c.bf16 %v27_v10, %v25_v9  ;;  %v20_v15 = vld [vmem:[%s307_s0 + $0x8] sm:$0xff]  ;;  %v29_v16 = vld [vmem:[%s306_s1 + $0x40] sm:$0xff] }
   0x5   :  { %148 = vmatpush1.bf16.xpose.msra.mxu0 %v147_v7  ;;  %v153_v14 = vpack.c.bf16 %v32_v12, %v30_v11  ;;  %118 = vmatprep.mubr.f32.mxu0 %v20_v15  ;;  %v31_v17 = vld [vmem:[%s306_s1 + $0x50] sm:$0xff]  ;;  %v34_v18 = vld [vmem:[%s306_s1 + $0x68] sm:$0xff]  ;;  %v36_v19 = vld [vmem:[%s306_s1 + $0x78] sm:$0xff] }
   0x6   :  { %150 = vmatprep.subr.bf16.mxu0 %v149_v8  ;;  %v155_v20 = vpack.c.bf16 %v31_v17, %v29_v16  ;;  %v157_v21 = vpack.c.bf16 %v36_v19, %v34_v18  ;;  %v33_v22 = vld [vmem:[%s306_s1 + $0x60] sm:$0xff]  ;;  %v35_v23 = vld [vmem:[%s306_s1 + $0x70] sm:$0xff]  ;;  %v38_v24 = vld [vmem:[%s306_s1 + $0x88] sm:$0xff] }
   0x7   :  { %v40_v25 = vld [vmem:[%s306_s1 + $0x98] sm:$0xff]  ;;  %v159_v26 = vpack.c.bf16 %v35_v23, %v33_v22  ;;  %v37_v28 = vld [vmem:[%s306_s1 + $0x80] sm:$0xff]  ;;  %v39_v29 = vld [vmem:[%s306_s1 + $0x90] sm:$0xff] }
   0x8   :  { %v161_v27 = vpack.c.bf16 %v40_v25, %v38_v24  ;;  %v42_v30 = vld [vmem:[%s306_s1 + $0xa8] sm:$0xff]  ;;  %v44_v31 = vld [vmem:[%s306_s1 + $0xb8] sm:$0xff]  ;;  %v163_v32 = vpack.c.bf16 %v39_v29, %v37_v28  ;;  %v41_v34 = vld [vmem:[%s306_s1 + $0xa0] sm:$0xff] }
   0x9   :  { %v165_v33 = vpack.c.bf16 %v44_v31, %v42_v30  ;;  %v43_v35 = vld [vmem:[%s306_s1 + $0xb0] sm:$0xff]  ;;  %v46_v36 = vld [vmem:[%s306_s1 + $0xc8] sm:$0xff]  ;;  %v48_v37 = vld [vmem:[%s306_s1 + $0xd8] sm:$0xff] }
   0xa   :  { %v167_v38 = vpack.c.bf16 %v43_v35, %v41_v34  ;;  %v169_v39 = vpack.c.bf16 %v48_v37, %v46_v36  ;;  %v45_v40 = vld [vmem:[%s306_s1 + $0xc0] sm:$0xff]  ;;  %v47_v41 = vld [vmem:[%s306_s1 + $0xd0] sm:$0xff]  ;;  %v50_v42 = vld [vmem:[%s306_s1 + $0xe8] sm:$0xff] }
   0xb   :  { %v52_v43 = vld [vmem:[%s306_s1 + $0xf8] sm:$0xff]  ;;  %v171_v44 = vpack.c.bf16 %v47_v41, %v45_v40  ;;  %v49_v46 = vld [vmem:[%s306_s1 + $0xe0] sm:$0xff]  ;;  %v51_v47 = vld [vmem:[%s306_s1 + $0xf0] sm:$0xff] }
   0xc   :  { %v173_v45 = vpack.c.bf16 %v52_v43, %v50_v42  ;;  %v175_v48 = vpack.c.bf16 %v51_v47, %v49_v46  ;;  %v19_v49 = vld [vmem:[%s307_s0] sm:$0xff] }
   0xd   :  { %152 = vmatpush1.bf16.xpose.msra.mxu0 %v151_v13  ;;  %v144_v51 = vld [vmem:[%s308_s2] ss:$0 sm:$0xff] }
   0xe   :  { %154 = vmatprep.subr.bf16.mxu0 %v153_v14 }
  0x15   :  { %156 = vmatpush1.bf16.xpose.msra.mxu0 %v155_v20 }
  0x16   :  { %158 = vmatprep.subr.bf16.mxu0 %v157_v21 }
  0x1d   :  { %160 = vmatpush1.bf16.xpose.msra.mxu0 %v159_v26 }
  0x1e   :  { %162 = vmatprep.subr.bf16.mxu0 %v161_v27 }
  0x25   :  { %164 = vmatpush1.bf16.xpose.msra.mxu0 %v163_v32 }
  0x26   :  { %166 = vmatprep.subr.bf16.mxu0 %v165_v33 }
  0x2d   :  { %168 = vmatpush1.bf16.xpose.msra.mxu0 %v167_v38 }
  0x2e   :  { %170 = vmatprep.subr.bf16.mxu0 %v169_v39 }
  0x35   :  { %172 = vmatpush1.bf16.xpose.msra.mxu0 %v171_v44 }
  0x36   :  { %174 = vmatprep.subr.bf16.mxu0 %v173_v45 }
  0x3d   :  { %176 = vmatpush1.bf16.xpose.msra.mxu0 %v175_v48 }
  0x44   :  { %119 = vmatmul.mubr.f32.vlgmr.msra.gmra.mrb[0].mxu0 %v19_v49 }
 0x117   :  { %v120_v50 = vpop.f32.mrb[0].mxu0 }
 0x118   :  { %v122_v52 = vpop.f32.mrb[1].mxu0  ;;  %v137_v53 = vadd.f32 %v144_v51, %v120_v50 }
 0x11a   :  { %v138_v54 = vmax.f32 %v137_v53, 0.0 }
 0x11c   :  { %139 = vst [vmem:[%s309_s3] sm:$0xff] %v138_v54 }

// kernel: forward.2
= control target key start
LH: loop header
LB: loop body
LE: loop exit
PB: predicated region body
PF: predicated region fallthrough
CT: control target
= control target key end

     0   :  { %8 = vsyncpa [#allocation3], 0  ;;  %s1144_s0 = inlined_call_operand.hbm [shape: f32[8,512], index: 0, kind: input, shape index: {}]   ;;  %s1145_s1 = inlined_call_operand.hbm [shape: f32[256,512], index: 1, kind: input, shape index: {}]   ;;  %s1146_s2 = inlined_call_operand.vmem [shape: f32[1,256], index: 2, kind: input, shape index: {}]   ;;  %s1147_s3 = inlined_call_operand.vmem [shape: f32[8,256], index: 3, kind: output, shape index: {}]  }
   0x1   :  { %9 = vsyncpa [#allocation5], 0 }
   0x2   :  { %11 = vsyncpa [#allocation5 + $0x1], 0  ;;  %s905_s12 = smov 0   ;;  %s907_s13 = smov 0  }
   0x3   :  { %s909_s14 = smov 0   ;;  %s911_s15 = smov 0  }
   0x4   :  { %s913_s16 = smov 0   ;;  %s915_s17 = smov 0  }
   0x5 LB: > { %s616_s18 = sadd.s32 4294967295, %s879_s17   ;;  %s73_s19 = sadd.s32 1, %s867_s14  ;;  %s879_s17 = sphi %s915_s17, %s17_s17   ;;  %s875_s16 = sphi %s913_s16, %s1167_s16   ;;  %s871_s15 = sphi %s911_s15, %s1166_s15   ;;  %s867_s14 = sphi %s909_s14, %s1165_s14   ;;  %s863_s13 = sphi %s907_s13, %s1164_s13   ;;  %s859_s12 = sphi %s905_s12, %s1163_s12  }
   0x6   : > { %p80_p0 = scmp.ne.s32.totalorder %s867_s14, %s863_s13  ;;  %p81_p1 = scmp.eq.s32.totalorder %s879_s17, 0 }
   0x7   : > { %p86_p2 = scmp.ne.s32.totalorder %s863_s13, %s859_s12  ;;  %p939_p3 = scmp.eq.s32.totalorder %s616_s18, 0 }
   0x8   : > { %p82_p4 = por %p81_p1, %p80_p0  ;;  %p618_p5 = scmp.ge.s32.totalorder %s879_s17, 1 }
   0x9   : > { %s1153_s20 = scalar_select %p939_p3, 1, 0 }
   0xa   : > { %p946_p6 = por %p939_p3, %p86_p2  ;;  %p151_p7 = scmp.lt.s32.totalorder %s879_s17, 3 }
   0xb   : > { %s881_s23 = smov [#allocation2]   ;;  %p713_p10 = scmp.lt.s32.totalorder %s879_s17, 2 }
   0xc   : > { %s1154_s21 = scalar_select %p946_p6, 1, 0 }
   0xd   : > { %p951_p8 = pnand %p618_p5, %p151_p7  ;;  %s169_s24 = sshll.u32 %s881_s23, 4  ;;  %s170_s24 = int_to_ptr.vmem [resolvable:$true] %s169_s24 }
   0xe   : > { %s180_s25 = sand.u32 1, %s867_s14   ;;  %p965_p12 = pnand %p713_p10, %p82_p4 }
   0xf   : > { %s1155_s22 = scalar_select %p951_p8, 1, 0 }
  0x10   : > { %p704_p9 = pneg %p951_p8  ;;  %s767_s30 = scalar_lea.hbm %s1144_s0, 512 }
  0x11   : > { %s1157_s27 = scalar_select %p965_p12, 1, 0 }
  0x12   : > { %p961_p11 = pnand %p704_p9, %p939_p3  ;;  %p768_p13 = scmp.ne.s32.totalorder %s1144_s0, %s767_s30 }
  0x13   : > { %p774_p5 = scmp.lt.u32.totalorder %s767_s30, %s1144_s0 }
  0x14   : > { %p769_p0 = pneg %p961_p11 }
  0x16   : > { %p770_p1 = pnand %p769_p0, %p768_p13 }
  0x18   : > { %p771_p2 = pneg %p770_p1 }
  0x1a   : > { %p776_p4 = pnand %p774_p5, %p771_p2 }
  0x1c   : > { %779 = shalt.err (!%p776_p4)
}
  0x1d   : > { %s780_s8 = scalar_lea.vmem %s170_s24, 512  ;;  %p788_p6 = scmp.lt.s32.totalorder %s170_s24, %s170_s24 }
  0x1e   : > { %p781_p7 = scmp.ne.s32.totalorder %s170_s24, %s780_s8  ;;  %p789_p3 = scmp.lt.s32.totalorder %s780_s8, %s780_s8 }
  0x20   : > { %p783_p9 = pnand %p781_p7, %p769_p0  ;;  %p790_p8 = por %p789_p3, %p788_p6 }
  0x22   : > { %p784_p10 = pneg %p783_p9 }
  0x24   : > { %p791_p12 = pnand %p790_p8, %p784_p10 }
  0x26   : > { %794 = shalt.err (!%p791_p12)
}
  0x27   : > { %707 = dma.hbm_to_vmem [thread:$0]  (!%p961_p11), %s1144_s0, 512, %s170_s24, [#allocation3]  }
  0x28   : > { %s32_s11 = sadd.s32 1, %s875_s16  ;;  %s621_s12 = sshll.u32 %s180_s25, 9 }
  0x29   : > { %p34_p13 = scmp.ge.s32.totalorder %s32_s11, 2  ;;  %s633_s18 = sshll.u32 %s875_s16, 13 }
  0x2a   : > { %s184_s23 = scalar_lea.vmem [#allocation4], %s621_s12  ;;  %s994_s30 = scalar_lea.hbm %s1145_s1, %s633_s18 }
  0x2b   : > { %s194_s28 = sshll.u32 %s184_s23, 4  ;;  %s1169_s11 = smov (%p34_p13, %s32_s11), 0  ;;  %s996_s28 = int_to_ptr.vmem [resolvable:$true] %s194_s28 }
  0x2c   : > { %s68_s24 = ssub.s32 %s875_s16, %s1169_s11  ;;  %s1006_s5 = scalar_lea.sflag [#allocation5], %s180_s25 }
  0x2d   : > { %p1000_p3 = scmp.eq.s32.totalorder %s68_s24, 0  ;;  %s795_s6 = scalar_lea.hbm %s994_s30, 8192 }
  0x2e   : > { %p796_p6 = scmp.ne.s32.totalorder %s994_s30, %s795_s6  ;;  %p1159_p8 = scmp.ne.s32.totalorder %s1157_s27, 0 }
  0x2f   : > { %s800_s9 = scalar_lea.hbm %s1145_s1, 16384  ;;  %p801_p1 = scmp.lt.u32.totalorder %s994_s30, %s1145_s1 }
  0x30   : > { %p797_p11 = pneg %p1159_p8  ;;  %p802_p2 = scmp.lt.u32.totalorder %s800_s9, %s795_s6 }
  0x31   : > { %p804_p4 = scmp.lt.u32.totalorder %s795_s6, %s994_s30 }
  0x32   : > { %p798_p12 = pnand %p797_p11, %p796_p6  ;;  %p803_p5 = por %p802_p2, %p801_p1 }
  0x34   : > { %p799_p0 = pneg %p798_p12  ;;  %p805_p7 = por %p804_p4, %p803_p5 }
  0x36   : > { %p806_p9 = pnand %p805_p7, %p799_p0 }
  0x38   : > { %809 = shalt.err (!%p806_p9)
}
  0x39   : > { %s810_s25 = scalar_lea.vmem %s996_s28, 8192  ;;  %s882_s18 = smov [#allocation4]  }
  0x3a   : > { %p811_p10 = scmp.ne.s32.totalorder %s996_s28, %s810_s25  ;;  %s815_s23 = sshll.u32 %s882_s18, 4  ;;  %s816_s23 = int_to_ptr.vmem [resolvable:$false] %s815_s23 }
  0x3b   : > { %s817_s26 = scalar_lea.vmem %s816_s23, 16384  ;;  %p818_p12 = scmp.lt.s32.totalorder %s996_s28, %s816_s23 }
  0x3c   : > { %p813_p13 = pnand %p811_p10, %p797_p11  ;;  %p819_p1 = scmp.lt.s32.totalorder %s817_s26, %s810_s25 }
  0x3e   : > { %p814_p6 = pneg %p813_p13  ;;  %p820_p2 = por %p819_p1, %p818_p12 }
  0x40   : > { %p821_p5 = pnand %p820_p2, %p814_p6 }
  0x42   : > { %824 = shalt.err (!%p821_p5)
}
  0x43   : > { %s883_s29 = smov 512   ;;  %s884_s24 = smov 32  }
  0x44   : > { %711 = dma.hbm_to_vmem [thread:$0]  (!%p1159_p8), %s994_s30, 8192, %s996_s28, %s1006_s5, %s883_s29, %s883_s29, %s884_s24  }
  0x45   : > { %s1039_s6 = scalar_select %p1000_p3, %s867_s14, %s73_s19  }
  0x46   : > { %p1160_p11 = scmp.ne.s32.totalorder %s1155_s22, 0 }
  0x47   : > { %p1161_p0 = scmp.ne.s32.totalorder (!%p1160_p11), %s1153_s20, 0 }
  0x48   : > { %212 = sbr.rel (%p1160_p11) target bundleno = 372 (0x174), region = 32 }
  0x4f   : > { %850 = dma.done.wait (%p1161_p0), [#allocation3], 512  }
  0x50   : > { %852 = vsyncadd (%p1161_p0), [#allocation3], 4294966784  ;;  %s218_s7 = sand.u32 1, %s863_s13   ;;  %p1162_p8 = scmp.ne.s32.totalorder %s1154_s21, 0 }
  0x51   : > { %s627_s8 = sshll.u32 %s218_s7, 9  ;;  %s219_s9 = scalar_lea.sflag [#allocation5], %s218_s7 }
  0x52   : > { %s1048_s27 = scalar_lea.vmem [#allocation4], %s627_s8 }
  0x53   : > { %854 = dma.done.wait (%p1162_p8), %s219_s9, 8192  }
  0x54   : > { %856 = vsyncadd (%p1162_p8), %s219_s9, 4294959104  ;;  %v275_v0 = vld [vmem:[%s1048_s27 + $0x8] sm:$0xff]  ;;  %v277_v2 = vld [vmem:[%s1048_s27 + $0x18] sm:$0xff]  ;;  %p254_p3 = scmp.lt.s32.totalorder %s871_s15, 1 }
  0x55   : > { %v279_v1 = vld [vmem:[%s1048_s27 + $0x28] sm:$0xff]  ;;  %v281_v4 = vld [vmem:[%s1048_s27 + $0x38] sm:$0xff]  ;;  %v274_v5 = vld [vmem:[%s1048_s27] sm:$0xff] }
  0x56   : > { %v634_v3 = vpack.c.bf16 %v279_v1, %v275_v0  ;;  %v278_v6 = vld [vmem:[%s1048_s27 + $0x20] sm:$0xff]  ;;  %v666_v7 = vpack.c.bf16 %v281_v4, %v277_v2  ;;  %v276_v9 = vld [vmem:[%s1048_s27 + $0x10] sm:$0xff]  ;;  %v283_v11 = vld [vmem:[%s1048_s27 + $0x48] sm:$0xff]  ;;  %s1171_s15 = smov (!%p254_p3, %s871_s15), 1 }
  0x57   : > { %v636_v8 = vpack.c.bf16 %v278_v6, %v274_v5  ;;  %v280_v10 = vld [vmem:[%s1048_s27 + $0x30] sm:$0xff]  ;;  %v287_v13 = vld [vmem:[%s1048_s27 + $0x68] sm:$0xff]  ;;  %v285_v14 = vld [vmem:[%s1048_s27 + $0x58] sm:$0xff]  ;;  %s256_s21 = scalar_lea.vmem %s1146_s2, %s1171_s15  ;;  %s628_s22 = sshll.u32 %s1171_s15, 3 }
  0x58   : > { %635 = vmatprep.subr.bf16.mxu0 %v634_v3  ;;  %v668_v12 = vpack.c.bf16 %v280_v10, %v276_v9  ;;  %v289_v15 = vld [vmem:[%s1048_s27 + $0x78] sm:$0xff]  ;;  %667 = vmatprep.subr.bf16.mxu1 %v666_v7  ;;  %v638_v16 = vpack.c.bf16 %v287_v13, %v283_v11  ;;  %v282_v18 = vld [vmem:[%s1048_s27 + $0x40] sm:$0xff]  ;;  %v284_v20 = vld [vmem:[%s1048_s27 + $0x50] sm:$0xff]  ;;  %s264_s4 = scalar_lea.vmem %s1147_s3, %s628_s22 }
  0x59   : > { %637 = vmatpush1.bf16.xpose.msra.mxu0 %v636_v8  ;;  %v670_v17 = vpack.c.bf16 %v289_v15, %v285_v14  ;;  %v286_v19 = vld [vmem:[%s1048_s27 + $0x60] sm:$0xff]  ;;  %v288_v21 = vld [vmem:[%s1048_s27 + $0x70] sm:$0xff]  ;;  %v291_v22 = vld [vmem:[%s1048_s27 + $0x88] sm:$0xff] }
  0x5a   : > { %669 = vmatpush1.bf16.xpose.msra.mxu1 %v668_v12  ;;  %639 = vmatprep.subr.bf16.mxu0 %v638_v16  ;;  %v295_v23 = vld [vmem:[%s1048_s27 + $0xa8] sm:$0xff]  ;;  %v293_v24 = vld [vmem:[%s1048_s27 + $0x98] sm:$0xff]  ;;  %v640_v26 = vpack.c.bf16 %v286_v19, %v282_v18  ;;  %v672_v27 = vpack.c.bf16 %v288_v21, %v284_v20  ;;  %v290_v30 = vld [vmem:[%s1048_s27 + $0x80] sm:$0xff] }
  0x5b   : > { %671 = vmatprep.subr.bf16.mxu1 %v670_v17  ;;  %v297_v25 = vld [vmem:[%s1048_s27 + $0xb8] sm:$0xff]  ;;  %v642_v28 = vpack.c.bf16 %v295_v23, %v291_v22  ;;  %v294_v31 = vld [vmem:[%s1048_s27 + $0xa0] sm:$0xff]  ;;  %v292_v32 = vld [vmem:[%s1048_s27 + $0x90] sm:$0xff] }
  0x5c   : > { %v674_v29 = vpack.c.bf16 %v297_v25, %v293_v24  ;;  %v296_v33 = vld [vmem:[%s1048_s27 + $0xb0] sm:$0xff]  ;;  %v299_v34 = vld [vmem:[%s1048_s27 + $0xc8] sm:$0xff]  ;;  %v301_v36 = vld [vmem:[%s1048_s27 + $0xd8] sm:$0xff]  ;;  %v644_v38 = vpack.c.bf16 %v294_v31, %v290_v30 }
  0x5d   : > { %v303_v35 = vld [vmem:[%s1048_s27 + $0xe8] sm:$0xff]  ;;  %v305_v37 = vld [vmem:[%s1048_s27 + $0xf8] sm:$0xff]  ;;  %v676_v39 = vpack.c.bf16 %v296_v33, %v292_v32  ;;  %v298_v42 = vld [vmem:[%s1048_s27 + $0xc0] sm:$0xff] }
  0x5e   : > { %v646_v40 = vpack.c.bf16 %v303_v35, %v299_v34  ;;  %v678_v41 = vpack.c.bf16 %v305_v37, %v301_v36  ;;  %v302_v43 = vld [vmem:[%s1048_s27 + $0xe0] sm:$0xff]  ;;  %v300_v44 = vld [vmem:[%s1048_s27 + $0xd0] sm:$0xff]  ;;  %v271_v45 = vld [vmem:[#allocation2 + $0x8] sm:$0xff] }
  0x5f   : > { %v273_v46 = vld [vmem:[#allocation2 + $0x18] sm:$0xff]  ;;  %v304_v47 = vld [vmem:[%s1048_s27 + $0xf0] sm:$0xff]  ;;  %v307_v48 = vld [vmem:[%s1048_s27 + $0x108] sm:$0xff]  ;;  %403 = vmatprep.mubr.f32.mxu0 %v271_v45  ;;  %v648_v52 = vpack.c.bf16 %v302_v43, %v298_v42 }
  0x60   : > { %v311_v49 = vld [vmem:[%s1048_s27 + $0x128] sm:$0xff]  ;;  %v309_v50 = vld [vmem:[%s1048_s27 + $0x118] sm:$0xff]  ;;  %473 = vmatprep.mubr.f32.mxu1 %v273_v46  ;;  %v680_v53 = vpack.c.bf16 %v304_v47, %v300_v44  ;;  %v306_v56 = vld [vmem:[%s1048_s27 + $0x100] sm:$0xff] }
  0x61   : > { %641 = vmatpush1.bf16.xpose.msra.mxu0 %v640_v26  ;;  %v313_v51 = vld [vmem:[%s1048_s27 + $0x138] sm:$0xff]  ;;  %v650_v54 = vpack.c.bf16 %v311_v49, %v307_v48  ;;  %v310_v57 = vld [vmem:[%s1048_s27 + $0x120] sm:$0xff]  ;;  %v308_v58 = vld [vmem:[%s1048_s27 + $0x110] sm:$0xff] }
  0x62   : > { %673 = vmatpush1.bf16.xpose.msra.mxu1 %v672_v27  ;;  %643 = vmatprep.subr.bf16.mxu0 %v642_v28  ;;  %v682_v55 = vpack.c.bf16 %v313_v51, %v309_v50  ;;  %v312_v59 = vld [vmem:[%s1048_s27 + $0x130] sm:$0xff]  ;;  %v315_v60 = vld [vmem:[%s1048_s27 + $0x148] sm:$0xff]  ;;  %v317_v62 = vld [vmem:[%s1048_s27 + $0x158] sm:$0xff]  ;;  %v652_v0 = vpack.c.bf16 %v310_v57, %v306_v56 }
  0x63   : > { %675 = vmatprep.subr.bf16.mxu1 %v674_v29  ;;  %v319_v61 = vld [vmem:[%s1048_s27 + $0x168] sm:$0xff]  ;;  %v321_v63 = vld [vmem:[%s1048_s27 + $0x178] sm:$0xff]  ;;  %v684_v1 = vpack.c.bf16 %v312_v59, %v308_v58  ;;  %v314_v4 = vld [vmem:[%s1048_s27 + $0x140] sm:$0xff] }
  0x64   : > { %v654_v2 = vpack.c.bf16 %v319_v61, %v315_v60  ;;  %v686_v3 = vpack.c.bf16 %v321_v63, %v317_v62  ;;  %v318_v5 = vld [vmem:[%s1048_s27 + $0x160] sm:$0xff]  ;;  %v316_v6 = vld [vmem:[%s1048_s27 + $0x150] sm:$0xff]  ;;  %v323_v8 = vld [vmem:[%s1048_s27 + $0x188] sm:$0xff] }
  0x65   : > { %v320_v7 = vld [vmem:[%s1048_s27 + $0x170] sm:$0xff]  ;;  %v327_v9 = vld [vmem:[%s1048_s27 + $0x1a8] sm:$0xff]  ;;  %v325_v10 = vld [vmem:[%s1048_s27 + $0x198] sm:$0xff]  ;;  %v656_v12 = vpack.c.bf16 %v318_v5, %v314_v4 }
  0x66   : > { %v329_v11 = vld [vmem:[%s1048_s27 + $0x1b8] sm:$0xff]  ;;  %v688_v13 = vpack.c.bf16 %v320_v7, %v316_v6  ;;  %v658_v14 = vpack.c.bf16 %v327_v9, %v323_v8  ;;  %v322_v16 = vld [vmem:[%s1048_s27 + $0x180] sm:$0xff]  ;;  %v324_v18 = vld [vmem:[%s1048_s27 + $0x190] sm:$0xff] }
  0x67   : > { %v690_v15 = vpack.c.bf16 %v329_v11, %v325_v10  ;;  %v326_v17 = vld [vmem:[%s1048_s27 + $0x1a0] sm:$0xff]  ;;  %v328_v19 = vld [vmem:[%s1048_s27 + $0x1b0] sm:$0xff]  ;;  %v331_v20 = vld [vmem:[%s1048_s27 + $0x1c8] sm:$0xff] }
  0x68   : > { %v335_v21 = vld [vmem:[%s1048_s27 + $0x1e8] sm:$0xff]  ;;  %v333_v22 = vld [vmem:[%s1048_s27 + $0x1d8] sm:$0xff]  ;;  %v660_v24 = vpack.c.bf16 %v326_v17, %v322_v16  ;;  %v692_v25 = vpack.c.bf16 %v328_v19, %v324_v18  ;;  %v330_v28 = vld [vmem:[%s1048_s27 + $0x1c0] sm:$0xff] }
  0x69   : > { %645 = vmatpush1.bf16.xpose.msra.mxu0 %v644_v38  ;;  %v337_v23 = vld [vmem:[%s1048_s27 + $0x1f8] sm:$0xff]  ;;  %v662_v26 = vpack.c.bf16 %v335_v21, %v331_v20  ;;  %v334_v29 = vld [vmem:[%s1048_s27 + $0x1e0] sm:$0xff]  ;;  %v332_v30 = vld [vmem:[%s1048_s27 + $0x1d0] sm:$0xff] }
  0x6a   : > { %677 = vmatpush1.bf16.xpose.msra.mxu1 %v676_v39  ;;  %647 = vmatprep.subr.bf16.mxu0 %v646_v40  ;;  %v694_v27 = vpack.c.bf16 %v337_v23, %v333_v22  ;;  %v336_v31 = vld [vmem:[%s1048_s27 + $0x1f0] sm:$0xff]  ;;  %v664_v32 = vpack.c.bf16 %v334_v29, %v330_v28  ;;  %v270_v34 = vld [vmem:[#allocation2] sm:$0xff] }
  0x6b   : > { %679 = vmatprep.subr.bf16.mxu1 %v678_v41  ;;  %v696_v33 = vpack.c.bf16 %v336_v31, %v332_v30  ;;  %v272_v35 = vld [vmem:[#allocation2 + $0x10] sm:$0xff]  ;;  %v629_v41 = vld [vmem:[%s256_s21] ss:$0 sm:$0xff] }
  0x71   : > { %649 = vmatpush1.bf16.xpose.msra.mxu0 %v648_v52 }
  0x72   : > { %681 = vmatpush1.bf16.xpose.msra.mxu1 %v680_v53  ;;  %651 = vmatprep.subr.bf16.mxu0 %v650_v54 }
  0x73   : > { %683 = vmatprep.subr.bf16.mxu1 %v682_v55 }
  0x79   : > { %653 = vmatpush1.bf16.xpose.msra.mxu0 %v652_v0 }
  0x7a   : > { %685 = vmatpush1.bf16.xpose.msra.mxu1 %v684_v1  ;;  %655 = vmatprep.subr.bf16.mxu0 %v654_v2 }
  0x7b   : > { %687 = vmatprep.subr.bf16.mxu1 %v686_v3 }
  0x81   : > { %657 = vmatpush1.bf16.xpose.msra.mxu0 %v656_v12 }
  0x82   : > { %689 = vmatpush1.bf16.xpose.msra.mxu1 %v688_v13  ;;  %659 = vmatprep.subr.bf16.mxu0 %v658_v14 }
  0x83   : > { %691 = vmatprep.subr.bf16.mxu1 %v690_v15 }
  0x89   : > { %661 = vmatpush1.bf16.xpose.msra.mxu0 %v660_v24 }
  0x8a   : > { %693 = vmatpush1.bf16.xpose.msra.mxu1 %v692_v25  ;;  %663 = vmatprep.subr.bf16.mxu0 %v662_v26 }
  0x8b   : > { %695 = vmatprep.subr.bf16.mxu1 %v694_v27 }
  0x91   : > { %665 = vmatpush1.bf16.xpose.msra.mxu0 %v664_v32 }
  0x92   : > { %697 = vmatpush1.bf16.xpose.msra.mxu1 %v696_v33 }
  0x98   : > { %404 = vmatmul.mubr.f32.vlgmr.msra.gmra.mrb[0].mxu0 %v270_v34 }
  0x99   : > { %474 = vmatmul.mubr.f32.vlgmr.msra.gmra.mrb[0].mxu1 %v272_v35 }
 0x16b   : > { %v405_v36 = vpop.f32.mrb[0].mxu0 }
 0x16c   : > { %v475_v37 = vpop.f32.mrb[0].mxu1  ;;  %v407_v38 = vpop.f32.mrb[1].mxu0 }
 0x16d   : > { %v476_v39 = vadd.f32 %v475_v37, %v405_v36  ;;  %v477_v40 = vpop.f32.mrb[1].mxu1 }
 0x16f   : > { %v492_v42 = vadd.f32 %v629_v41, %v476_v39 }
 0x171   : > { %v493_v43 = vmax.f32 %v492_v42, 0.0 }
 0x173   : > { %494 = vst [vmem:[%s264_s4] sm:$0xff] %v493_v43 }
 0x174 PF: > { %s17_s17 = sadd.s32 1, %s879_s17   ;;  %s1163_s12 = smov %s863_s13 }
 0x175   : > { %p14_p4 = scmp.ge.s32.totalorder %s17_s17, 4   ;;  %s1164_s13 = smov %s867_s14 }
 0x176   : > { %s1165_s14 = smov %s1039_s6  ;;  %s1166_s15 = smov %s875_s16 }
 0x177   : > { %s1167_s16 = smov %s1169_s11  ;;  %16 = sbr.rel (!%p14_p4) target bundleno = 5 (0x5), region = 89 }
 0x17e   :  { %522 = vsyncpa [#allocation3], 1 }
 0x17f   :  { %524 = vsyncpa [#allocation3 + $0x1], 1 }
 0x180   :  { %525 = vsyncpa [#allocation5], 1 }
 0x181   :  { %527 = vsyncpa [#allocation5 + $0x1], 1 }

</bundles_post_ra>
